<compile_context>
chip_gen: v7x
topology: tpu7x:2x2x1
jax: 0.10.0
libtpu: 0.0.40
codegen_flags: <defaults>
</compile_context>

<pallas_src>
import jax
import jax.numpy as jnp
from jax.experimental import pallas as pl
from jax.experimental.pallas import tpu as pltpu


def coronae_dec_kernel(x_ref, hp_ref, lp_ref, hi_ref, lo_ref):
    # x_ref:  (TB, TL) interleaved (re, im) float32 frequency plane.
    # hp_ref / lp_ref: (1, TL) masks (values repeated x2 to cover re & im),
    # kept resident across the image grid axis by the constant index_map.
    x = x_ref[...]
    hi_ref[...] = x * hp_ref[...]
    lo_ref[...] = x * lp_ref[...]


def _choose_tiles(BC, L, target_block_bytes=1 << 20):
    """Pick (TB, TL) so the input block is ~target_block_bytes and respects
    the (8, 128) tiling rule (dims are multiples of (8,128) or full extent)."""
    # Lane tile: keep the full (lane-dense) width unless a single image row is
    # already bigger than the budget AND it can be split on 128-lane boundaries.
    if L * 4 <= target_block_bytes or L % 128 != 0:
        TL = L
    else:
        TL = max(128, (target_block_bytes // 4 // 128) * 128)
        TL = min(TL, L)

    TB = max(1, target_block_bytes // (TL * 4))
    if TB >= BC:
        TB = BC                      # full extent -> always legal
    else:
        TB = max(8, (TB // 8) * 8)   # multiple of 8 (sublane rule)
        TB = min(TB, BC)             # (if BC < 8 we already took the BC branch)
    return TB, TL


def semifinest_dec(x, hipass, lowpass):
    """Forward pass of semifinestDec.

    Args:
      x:       (B, C, N1, N2) float32, NCHW like the PyTorch module.
      hipass:  (N1, N2) float32 frequency-domain high-pass mask.
      lowpass: (N1, N2) float32 frequency-domain low-pass mask.
    Returns:
      (high, low): two (B, C, N1, N2) float32 arrays.
    """
    B, C, N1, N2 = x.shape
    BC = B * C
    L = N1 * N2 * 2  # interleaved (re, im) length

    # FFT glue (complex FFT has no Pallas TPU equivalent).
    Xf = jnp.fft.fft2(x.astype(jnp.float32), axes=(-2, -1))  # (B,C,N1,N2) c64
    Xf = Xf.reshape(BC, N1, N2)
    # Interleave (re, im) along the last axis -> lane-dense float32 plane.
    x_ri = jnp.stack([jnp.real(Xf), jnp.imag(Xf)], axis=-1)
    x_ri = x_ri.reshape(BC, L).astype(jnp.float32)

    # Masks interleaved (each value repeated twice) to stay aligned with (re, im).
    hp = jnp.repeat(hipass.astype(jnp.float32).reshape(-1), 2).reshape(1, L)
    lp = jnp.repeat(lowpass.astype(jnp.float32).reshape(-1), 2).reshape(1, L)

    TB, TL = _choose_tiles(BC, L)
    grid = (pl.cdiv(BC, TB), pl.cdiv(L, TL))

    img_spec = pl.BlockSpec((TB, TL), lambda i, j: (i, j))
    mask_spec = pl.BlockSpec((1, TL), lambda i, j: (0, j))
    out_sds = jax.ShapeDtypeStruct((BC, L), jnp.float32)

    cost = pl.CostEstimate(
        flops=2 * BC * L,                      # two multiplies per element
        transcendentals=0,
        bytes_accessed=(3 * BC * L + 2 * L) * 4,
    )

    h_ri, l_ri = pl.pallas_call(
        coronae_dec_kernel,
        out_shape=(out_sds, out_sds),
        grid=grid,
        in_specs=[img_spec, mask_spec, mask_spec],
        out_specs=(img_spec, img_spec),
        compiler_params=pltpu.CompilerParams(
            dimension_semantics=("parallel", "parallel"),
            vmem_limit_bytes=32 * 1024 * 1024,
        ),
        cost_estimate=cost,
    )(x_ri, hp, lp)

    def to_complex(p):
        p = p.reshape(BC, N1, N2, 2)
        return jax.lax.complex(p[..., 0], p[..., 1])

    high = jnp.fft.ifft2(to_complex(h_ri), axes=(-2, -1)).real
    low = jnp.fft.ifft2(to_complex(l_ri), axes=(-2, -1)).real
    high = high.reshape(B, C, N1, N2).astype(x.dtype)
    low = low.reshape(B, C, N1, N2).astype(x.dtype)
    return high, low


def make_coronae_filters(N1, N2):
    """Deterministic radial high/low-pass masks (stand-ins for hipassSF/lowpassSF)."""
    fy = jnp.fft.fftfreq(N1)[:, None]          # (N1, 1)
    fx = jnp.fft.fftfreq(N2)[None, :]          # (1, N2)
    r = jnp.sqrt(fy * fy + fx * fx)            # radial frequency in [0, ~0.707]
    lowpass = jnp.exp(-((r / 0.25) ** 2)).astype(jnp.float32)
    hipass = jnp.sqrt(jnp.clip(1.0 - lowpass ** 2, 0.0, 1.0)).astype(jnp.float32)
    return hipass, lowpass


if __name__ == "__main__":
    # Small shapes consistent with the module's (B, C, N1, N2) NCHW input.
    B, C, N1, N2 = 2, 4, 16, 16
    key = jax.random.PRNGKey(0)
    x = jax.random.normal(key, (B, C, N1, N2), dtype=jnp.float32)

    hipass, lowpass = make_coronae_filters(N1, N2)

    high, low = semifinest_dec(x, hipass, lowpass)
    jax.block_until_ready((high, low))

    # Sanity check against a pure-JAX reference of the same semantics.
    Xf = jnp.fft.fft2(x, axes=(-2, -1))
    ref_high = jnp.fft.ifft2(Xf * hipass[None, None], axes=(-2, -1)).real
    ref_low = jnp.fft.ifft2(Xf * lowpass[None, None], axes=(-2, -1)).real
    assert jnp.allclose(high, ref_high, atol=1e-5), "high-band mismatch"
    assert jnp.allclose(low, ref_low, atol=1e-5), "low-band mismatch"
    assert high.shape == (B, C, N1, N2) and low.shape == (B, C, N1, N2)

    print("KERNEL_OK")
</pallas_src>

<mosaic_0001>
module attributes {stable_mosaic.version = 11 : i64} {
  func.func @coronae_dec_kernel(%arg0: i32, %arg1: i32, %arg2: memref<8x512xf32, #tpu.memory_space<vmem>>, %arg3: memref<1x512xf32, #tpu.memory_space<vmem>>, %arg4: memref<1x512xf32, #tpu.memory_space<vmem>>, %arg5: memref<8x512xf32, #tpu.memory_space<vmem>>, %arg6: memref<8x512xf32, #tpu.memory_space<vmem>>) attributes {dimension_semantics = [#tpu.dimension_semantics<parallel>, #tpu.dimension_semantics<parallel>], iteration_bounds = array<i64: 1, 1>, scalar_prefetch = 0 : i64, scratch_operands = 0 : i64, tpu.core_type = #tpu.core_type<tc>, window_params = [{transform_indices = @transform_0, window_bounds = array<i64: 8, 512>}, {transform_indices = @transform_1, window_bounds = array<i64: 1, 512>}, {transform_indices = @transform_2, window_bounds = array<i64: 1, 512>}, {transform_indices = @transform_3, window_bounds = array<i64: 8, 512>}, {transform_indices = @transform_4, window_bounds = array<i64: 8, 512>}]} {
    %c0 = arith.constant 0 : index
    %c0_0 = arith.constant 0 : index
    %0 = vector.load %arg2[%c0, %c0_0] : memref<8x512xf32, #tpu.memory_space<vmem>>, vector<8x512xf32>
    %c0_1 = arith.constant 0 : index
    %c0_2 = arith.constant 0 : index
    %1 = vector.load %arg3[%c0_1, %c0_2] : memref<1x512xf32, #tpu.memory_space<vmem>>, vector<1x512xf32>
    %2 = vector.broadcast %1 : vector<1x512xf32> to vector<8x512xf32>
    %3 = arith.mulf %0, %2 : vector<8x512xf32>
    %c0_3 = arith.constant 0 : index
    %c0_4 = arith.constant 0 : index
    %4 = vector.load %arg5[%c0_3, %c0_4] : memref<8x512xf32, #tpu.memory_space<vmem>>, vector<8x512xf32>
    tpu.vector_store %arg5[%c0_3, %c0_4], %3 {strides = array<i32>} : memref<8x512xf32, #tpu.memory_space<vmem>>, vector<8x512xf32>,
    %c0_5 = arith.constant 0 : index
    %c0_6 = arith.constant 0 : index
    %5 = vector.load %arg4[%c0_5, %c0_6] : memref<1x512xf32, #tpu.memory_space<vmem>>, vector<1x512xf32>
    %6 = vector.broadcast %5 : vector<1x512xf32> to vector<8x512xf32>
    %7 = arith.mulf %0, %6 : vector<8x512xf32>
    %c0_7 = arith.constant 0 : index
    %c0_8 = arith.constant 0 : index
    %8 = vector.load %arg6[%c0_7, %c0_8] : memref<8x512xf32, #tpu.memory_space<vmem>>, vector<8x512xf32>
    tpu.vector_store %arg6[%c0_7, %c0_8], %7 {strides = array<i32>} : memref<8x512xf32, #tpu.memory_space<vmem>>, vector<8x512xf32>,
    return
  }
  func.func @transform_0(%arg0: i32, %arg1: i32) -> (i32, i32) {
    %c0_i32 = arith.constant 0 : i32
    return %arg0, %arg1 : i32, i32
  }
  func.func @transform_1(%arg0: i32, %arg1: i32) -> (i32, i32) {
    %c0_i32 = arith.constant 0 : i32
    %c0_i32_0 = arith.constant 0 : i32
    return %c0_i32, %arg1 : i32, i32
  }
  func.func @transform_2(%arg0: i32, %arg1: i32) -> (i32, i32) {
    %c0_i32 = arith.constant 0 : i32
    %c0_i32_0 = arith.constant 0 : i32
    return %c0_i32, %arg1 : i32, i32
  }
  func.func @transform_3(%arg0: i32, %arg1: i32) -> (i32, i32) {
    %c0_i32 = arith.constant 0 : i32
    return %arg0, %arg1 : i32, i32
  }
  func.func @transform_4(%arg0: i32, %arg1: i32) -> (i32, i32) {
    %c0_i32 = arith.constant 0 : i32
    return %arg0, %arg1 : i32, i32
  }
}

</mosaic_0001>

<bundles_post_ra>
// kernel: tpu_custom_call.1
= control target key start
LH: loop header
LB: loop body
LE: loop exit
PB: predicated region body
PF: predicated region fallthrough
CT: control target
= control target key end

     0   :  { %10 = vsyncpa [#allocation3], 0  ;;  %s323_s0 = inlined_call_operand.hbm [shape: f32[8,512], index: 0, kind: input, shape index: {}]   ;;  %s324_s1 = inlined_call_operand.hbm [shape: f32[1,512], index: 1, kind: input, shape index: {}]   ;;  %s325_s2 = inlined_call_operand.vmem [shape: f32[1,512], index: 2, kind: input, shape index: {}]   ;;  %s326_s3 = inlined_call_operand.hbm [shape: f32[8,512], index: 3, kind: output, shape index: {0}]   ;;  %s327_s4 = inlined_call_operand.hbm [shape: f32[8,512], index: 4, kind: output, shape index: {1}]  }
   0x1   :  { %11 = vsyncpa [#allocation6], 0 }
   0x2   :  { %12 = vsyncpa [#allocation4], 0 }
   0x3   :  { %13 = vsyncpa [#allocation9], 0  ;;  %s236_s15 = smov [#allocation2]   ;;  %s237_s17 = smov [#allocation5]  }
   0x4   :  { %s20_s16 = sshll.u32 %s236_s15, 4  ;;  %s30_s18 = sshll.u32 %s237_s17, 4  ;;  %s21_s16 = int_to_ptr.vmem [resolvable:$true] %s20_s16  ;;  %s31_s18 = int_to_ptr.vmem [resolvable:$true] %s30_s18 }
   0x5   :  { %s140_s21 = scalar_lea.hbm %s323_s0, 512 }
   0x6   :  { %p141_p0 = scmp.ne.s32.totalorder %s323_s0, %s140_s21  ;;  %p144_p1 = scmp.lt.u32.totalorder %s140_s21, %s323_s0 }
   0x8   :  { %p146_p2 = pnand %p144_p1, %p141_p0 }
   0xa   :  { %149 = shalt.err (!%p146_p2)
}
   0xb   :  { %s150_s26 = scalar_lea.vmem %s21_s16, 512  ;;  %p155_p4 = scmp.lt.s32.totalorder %s21_s16, %s21_s16 }
   0xc   :  { %p151_p3 = scmp.ne.s32.totalorder %s21_s16, %s150_s26  ;;  %p156_p5 = scmp.lt.s32.totalorder %s150_s26, %s150_s26 }
   0xe   :  { %p157_p6 = por %p156_p5, %p155_p4 }
  0x10   :  { %p158_p7 = pnand %p157_p6, %p151_p3 }
  0x12   :  { %161 = shalt.err (!%p158_p7)
}
  0x13   :  { %23 = dma.hbm_to_vmem [thread:$0]  %s323_s0, 512, %s21_s16, [#allocation3]  }
  0x14   :  { %s162_s5 = scalar_lea.hbm %s324_s1, 64 }
  0x15   :  { %p163_p8 = scmp.ne.s32.totalorder %s324_s1, %s162_s5  ;;  %p166_p9 = scmp.lt.u32.totalorder %s162_s5, %s324_s1 }
  0x17   :  { %p168_p10 = pnand %p166_p9, %p163_p8 }
  0x19   :  { %171 = shalt.err (!%p168_p10)
}
  0x1a   :  { %s172_s10 = scalar_lea.vmem %s31_s18, 64  ;;  %p177_p12 = scmp.lt.s32.totalorder %s31_s18, %s31_s18 }
  0x1b   :  { %p173_p11 = scmp.ne.s32.totalorder %s31_s18, %s172_s10  ;;  %p178_p13 = scmp.lt.s32.totalorder %s172_s10, %s172_s10 }
  0x1d   :  { %p179_p0 = por %p178_p13, %p177_p12 }
  0x1f   :  { %p180_p1 = pnand %p179_p0, %p173_p11 }
  0x21   :  { %183 = shalt.err (!%p180_p1)
}
  0x22   :  { %33 = dma.hbm_to_vmem [thread:$0]  %s324_s1, 64, %s31_s18, [#allocation6]  }
  0x23   :  { %228 = dma.done.wait [#allocation3], 512  }
  0x24   :  { %229 = vsyncadd [#allocation3], 4294966784 }
  0x25   :  { %230 = dma.done.wait [#allocation6], 64  }
  0x26   :  { %231 = vsyncadd [#allocation6], 4294967232  ;;  %v48_v0 = vlaneseq  ;;  %v42_v6 = vld [vmem:[#allocation2] sm:$0xff]  ;;  %v43_v8 = vld [vmem:[#allocation2 + $0x8] sm:$0xff]  ;;  %s238_s12 = smov [#allocation7]   ;;  %s239_s15 = smov [#allocation8]  }
  0x27   :  { %v46_v7 = vld [vmem:[#allocation5] sm:$0xf]  ;;  %s112_s13 = sshll.u32 %s238_s12, 4  ;;  %v44_v11 = vld [vmem:[#allocation2 + $0x10] sm:$0xff]  ;;  %v45_v13 = vld [vmem:[#allocation2 + $0x18] sm:$0xff]  ;;  %s122_s16 = sshll.u32 %s239_s15, 4  ;;  %s113_s13 = int_to_ptr.vmem [resolvable:$true] %s112_s13  ;;  %s292_s16 = int_to_ptr.vmem [resolvable:$true] %s122_s16 }
  0x28   :  { %v49_v1 = vshrl.u32 %v48_v0, 7  ;;  %v76_v15 = vld [vmem:[%s325_s2] sm:$0xf]  ;;  %s184_s2 = scalar_lea.vmem %s113_s13, 512  ;;  %p189_p3 = scmp.lt.s32.totalorder %s113_s13, %s113_s13 }
  0x29   :  { %p185_p2 = scmp.ne.s32.totalorder %s113_s13, %s184_s2  ;;  %p190_p4 = scmp.lt.s32.totalorder %s184_s2, %s184_s2 }
  0x2a   :  { %v50_v2 = vsub.s32 0, %v49_v1  ;;  %v54_v3 = vsub.s32 1, %v49_v1  ;;  %v58_v4 = vsub.s32 2, %v49_v1  ;;  %v62_v5 = vsub.s32 3, %v49_v1 }
  0x2b   :  { %p191_p5 = por %p190_p4, %p189_p3 }
  0x2c   :  { %v51_v9 = vrot.slane %v46_v7, %v50_v2  ;;  %v55_v10 = vrot.slane %v46_v7, %v54_v3  ;;  %v59_v12 = vrot.slane %v46_v7, %v58_v4  ;;  %v63_v14 = vrot.slane %v46_v7, %v62_v5 }
  0x2d   :  { %v81_v16 = vrot.slane %v76_v15, %v50_v2  ;;  %v85_v17 = vrot.slane %v76_v15, %v54_v3  ;;  %v89_v18 = vrot.slane %v76_v15, %v58_v4  ;;  %v93_v19 = vrot.slane %v76_v15, %v62_v5  ;;  %p192_p6 = pnand %p191_p5, %p185_p2 }
  0x2e   :  { %v68_v20 = vmul.f32 %v51_v9, %v42_v6  ;;  %v69_v21 = vmul.f32 %v55_v10, %v43_v8  ;;  %v70_v22 = vmul.f32 %v59_v12, %v44_v11  ;;  %v71_v23 = vmul.f32 %v63_v14, %v45_v13 }
  0x2f   :  { %v98_v24 = vmul.f32 %v81_v16, %v42_v6  ;;  %v99_v25 = vmul.f32 %v85_v17, %v43_v8  ;;  %v100_v26 = vmul.f32 %v89_v18, %v44_v11  ;;  %v101_v27 = vmul.f32 %v93_v19, %v45_v13 }
  0x30   :  { %72 = vst [vmem:[#allocation7] sm:$0xff] %v68_v20  ;;  %73 = vst [vmem:[#allocation7 + $0x8] sm:$0xff] %v69_v21 }
  0x31   :  { %74 = vst [vmem:[#allocation7 + $0x10] sm:$0xff] %v70_v22  ;;  %75 = vst [vmem:[#allocation7 + $0x18] sm:$0xff] %v71_v23 }
  0x32   :  { %102 = vst [vmem:[#allocation8] sm:$0xff] %v98_v24  ;;  %103 = vst [vmem:[#allocation8 + $0x8] sm:$0xff] %v99_v25 }
  0x33   :  { %104 = vst [vmem:[#allocation8 + $0x10] sm:$0xff] %v100_v26  ;;  %105 = vst [vmem:[#allocation8 + $0x18] sm:$0xff] %v101_v27 }
  0x34   :  { %195 = shalt.err (!%p192_p6)
}
  0x35   :  { %s196_s19 = scalar_lea.hbm %s326_s3, 512 }
  0x36   :  { %p197_p7 = scmp.ne.s32.totalorder %s326_s3, %s196_s19  ;;  %p200_p8 = scmp.lt.u32.totalorder %s196_s19, %s326_s3 }
  0x38   :  { %p202_p9 = pnand %p200_p8, %p197_p7 }
  0x3a   :  { %205 = shalt.err (!%p202_p9)
}
  0x3b   :  { %115 = dma.vmem_to_hbm [thread:$0]  %s113_s13, 512, %s326_s3, [#allocation4]  }
  0x3c   :  { %s206_s26 = scalar_lea.vmem %s292_s16, 512  ;;  %p211_p11 = scmp.lt.s32.totalorder %s292_s16, %s292_s16 }
  0x3d   :  { %p207_p10 = scmp.ne.s32.totalorder %s292_s16, %s206_s26  ;;  %p212_p12 = scmp.lt.s32.totalorder %s206_s26, %s206_s26 }
  0x3f   :  { %p213_p13 = por %p212_p12, %p211_p11 }
  0x41   :  { %p214_p0 = pnand %p213_p13, %p207_p10 }
  0x43   :  { %217 = shalt.err (!%p214_p0)
}
  0x44   :  { %s218_s29 = scalar_lea.hbm %s327_s4, 512 }
  0x45   :  { %p219_p1 = scmp.ne.s32.totalorder %s327_s4, %s218_s29  ;;  %p222_p2 = scmp.lt.u32.totalorder %s218_s29, %s327_s4 }
  0x47   :  { %p224_p3 = pnand %p222_p2, %p219_p1 }
  0x49   :  { %227 = shalt.err (!%p224_p3)
}
  0x4a   :  { %125 = dma.vmem_to_hbm [thread:$0]  %s292_s16, 512, %s327_s4, [#allocation9]  }
  0x4b   :  { %232 = dma.done.wait [#allocation4], 512  }
  0x4c   :  { %233 = vsyncadd [#allocation4], 4294966784 }
  0x4d   :  { %234 = dma.done.wait [#allocation9], 512  }
  0x4e   :  { %235 = vsyncadd [#allocation9], 4294966784 }
  0x4f   :  { %132 = vsyncpa [#allocation3], 1 }
  0x50   :  { %133 = vsyncpa [#allocation6], 1 }
  0x51   :  { %134 = vsyncpa [#allocation4], 1 }
  0x52   :  { %135 = vsyncpa [#allocation9], 1 }

</bundles_post_ra>
